<compile_context>
chip_gen: v7x
topology: tpu7x:2x2x1
jax: 0.10.0
libtpu: 0.0.40
codegen_flags: <defaults>
</compile_context>

<pallas_src>
import functools
import math

import jax
import jax.numpy as jnp
from jax import lax
from jax.experimental import pallas as pl
from jax.experimental.pallas import tpu as pltpu

_LANES = 128
_SUBLANES = 8
_VMEM_LIMIT = 32 * 1024 * 1024


def _pick_rows_per_iter(tile_rows):
    """Largest of (32, 16, 8) that divides tile_rows (tile_rows % 8 == 0)."""
    for cand in (32, 16, 8):
        if tile_rows % cand == 0:
            return cand
    return tile_rows


# ----------------------------- kernels --------------------------------------
def _l1_reduce_kernel(pred_ref, tgt_ref, loss_ref, cnt_ref, *,
                      eps, rows, tile_rows, rows_per_iter, mask_rows):
    """One grid step: per-tile (8,128) partial sums of |p-t|*mask and mask.

    The tile is consumed in (rows_per_iter, 128) slabs via lax.fori_loop with
    an in-register (8,128) carry, so no tile-sized intermediate is ever
    materialized (no VMEM spills beyond the BlockSpec-managed input buffers).
    Grid is fully "parallel": each step writes its own output block.
    """
    tile_idx = pl.program_id(0)
    n_iters = tile_rows // rows_per_iter
    if mask_rows:
        base = tile_idx * tile_rows
        row_iota = lax.broadcasted_iota(jnp.int32, (rows_per_iter, _LANES), 0)

    def body(g, carry):
        acc_l, acc_c = carry
        r0 = pl.multiple_of(g * rows_per_iter, rows_per_iter)
        p = pred_ref[pl.ds(r0, rows_per_iter), :].astype(jnp.float32)
        t = tgt_ref[pl.ds(r0, rows_per_iter), :].astype(jnp.float32)
        valid = t > eps
        if mask_rows:
            # Last tile may overhang the array; its out-of-bounds rows hold
            # undefined VMEM contents -> mask them out by global row index.
            valid = valid & ((row_iota + (base + r0)) < rows)
        # select (not multiply) so garbage/NaN rows cannot propagate.
        diff = jnp.where(valid, jnp.abs(p - t), 0.0)
        cnt = valid.astype(jnp.float32)
        # (k*8,128) -> (k,8,128) sum: plain in-register VPU adds.
        acc_l = acc_l + diff.reshape(-1, _SUBLANES, _LANES).sum(axis=0)
        acc_c = acc_c + cnt.reshape(-1, _SUBLANES, _LANES).sum(axis=0)
        return acc_l, acc_c

    zeros = jnp.zeros((_SUBLANES, _LANES), jnp.float32)
    acc_l, acc_c = lax.fori_loop(0, n_iters, body, (zeros, zeros))
    loss_ref[...] = acc_l
    cnt_ref[...] = acc_c


def _l1_none_kernel(pred_ref, tgt_ref, out_ref, *,
                    eps, loss_weight, rows_per_iter):
    """Per-element masked L1 (reduction='none'), loss_weight folded in."""
    n_iters = out_ref.shape[0] // rows_per_iter

    @pl.loop(0, n_iters)
    def _(g):
        r0 = pl.multiple_of(g * rows_per_iter, rows_per_iter)
        p = pred_ref[pl.ds(r0, rows_per_iter), :].astype(jnp.float32)
        t = tgt_ref[pl.ds(r0, rows_per_iter), :].astype(jnp.float32)
        loss = jnp.where(t > eps, jnp.abs(p - t), 0.0)
        if loss_weight != 1.0:
            loss = loss * loss_weight
        out_ref[pl.ds(r0, rows_per_iter), :] = loss.astype(out_ref.dtype)


# ----------------------------- wrapper ---------------------------------------
def metric_depth_l1_loss(pred, target, *, reduction="mean", loss_weight=1.0,
                         eps=-1.0, tile_rows=4096):
    assert pred.shape == target.shape, (
        f"The shapes of pred ({pred.shape}) and target ({target.shape}) "
        f"are mismatched")
    assert reduction in ("none", "mean", "sum")
    assert tile_rows > 0 and tile_rows % 32 == 0

    eps = float(eps)
    loss_weight = float(loss_weight)
    orig_shape = pred.shape
    n = int(math.prod(orig_shape)) if orig_shape else 1
    out_dtype = jnp.promote_types(pred.dtype, target.dtype)

    # Inputs are consumed at their native dtype (bf16 halves HBM reads);
    # upcast to f32 happens inside the kernel.
    pred_flat = pred.reshape(-1)
    tgt_flat = target.reshape(-1)

    # Main part: the largest prefix that forms whole (8, 128) vregs.  The
    # (<1024 elem) tail is handled in plain JAX -- no jnp.pad HBM round trip.
    rows_total = n // _LANES
    main_rows = (rows_total // _SUBLANES) * _SUBLANES
    main_n = main_rows * _LANES
    tail_n = n - main_n

    main_out = None
    main_loss_sum = None
    main_cnt_sum = None

    if main_rows > 0:
        if main_n == n:
            p2d = pred_flat.reshape(main_rows, _LANES)   # free reshape
            t2d = tgt_flat.reshape(main_rows, _LANES)
        else:
            p2d = pred_flat[:main_n].reshape(main_rows, _LANES)
            t2d = tgt_flat[:main_n].reshape(main_rows, _LANES)

        tr = min(tile_rows, main_rows)                    # both multiples of 8
        rpi = _pick_rows_per_iter(tr)
        num_tiles = pl.cdiv(main_rows, tr)
        mask_rows = (main_rows % tr) != 0
        in_bytes = (p2d.size * p2d.dtype.itemsize
                    + t2d.size * t2d.dtype.itemsize)

        if reduction == "none":
            out_bytes = main_n * jnp.dtype(out_dtype).itemsize
            main_out = pl.pallas_call(
                functools.partial(_l1_none_kernel, eps=eps,
                                  loss_weight=loss_weight, rows_per_iter=rpi),
                out_shape=jax.ShapeDtypeStruct((main_rows, _LANES), out_dtype),
                grid=(num_tiles,),
                in_specs=[pl.BlockSpec((tr, _LANES), lambda i: (i, 0)),
                          pl.BlockSpec((tr, _LANES), lambda i: (i, 0))],
                out_specs=pl.BlockSpec((tr, _LANES), lambda i: (i, 0)),
                compiler_params=pltpu.CompilerParams(
                    dimension_semantics=("parallel",),
                    vmem_limit_bytes=_VMEM_LIMIT),
                cost_estimate=pl.CostEstimate(
                    flops=4 * main_n, transcendentals=0,
                    bytes_accessed=in_bytes + out_bytes),
            )(p2d, t2d)
        else:
            partial_loss, partial_cnt = pl.pallas_call(
                functools.partial(_l1_reduce_kernel, eps=eps, rows=main_rows,
                                  tile_rows=tr, rows_per_iter=rpi,
                                  mask_rows=mask_rows),
                out_shape=(
                    jax.ShapeDtypeStruct((num_tiles, _SUBLANES, _LANES),
                                         jnp.float32),
                    jax.ShapeDtypeStruct((num_tiles, _SUBLANES, _LANES),
                                         jnp.float32),
                ),
                grid=(num_tiles,),
                in_specs=[pl.BlockSpec((tr, _LANES), lambda i: (i, 0)),
                          pl.BlockSpec((tr, _LANES), lambda i: (i, 0))],
                out_specs=(
                    pl.BlockSpec((None, _SUBLANES, _LANES),
                                 lambda i: (i, 0, 0)),
                    pl.BlockSpec((None, _SUBLANES, _LANES),
                                 lambda i: (i, 0, 0)),
                ),
                compiler_params=pltpu.CompilerParams(
                    dimension_semantics=("parallel",),
                    vmem_limit_bytes=_VMEM_LIMIT),
                cost_estimate=pl.CostEstimate(
                    flops=6 * main_n, transcendentals=0,
                    bytes_accessed=in_bytes
                    + 2 * num_tiles * _SUBLANES * _LANES * 4),
            )(p2d, t2d)
            # Tiny (num_tiles, 8, 128) reduce in XLA; kept outside the kernel
            # so the whole grid stays "parallel" (megacore-friendly on v7x).
            main_loss_sum = partial_loss.sum()
            main_cnt_sum = partial_cnt.sum()

    # --- tail (<1024 elements) in plain JAX -----------------------------------
    tail_elem = None
    tail_valid = None
    if tail_n > 0:
        p_tail = pred_flat[main_n:].astype(jnp.float32)
        t_tail = tgt_flat[main_n:].astype(jnp.float32)
        tail_valid = t_tail > eps
        tail_elem = jnp.where(tail_valid, jnp.abs(p_tail - t_tail), 0.0)

    if reduction == "none":
        if main_rows > 0 and tail_n > 0:
            tail_out = tail_elem
            if loss_weight != 1.0:
                tail_out = tail_out * loss_weight
            flat = jnp.concatenate(
                [main_out.reshape(-1), tail_out.astype(out_dtype)])
            return flat.reshape(orig_shape)
        if main_rows > 0:
            return main_out.reshape(orig_shape)
        out = tail_elem
        if loss_weight != 1.0:
            out = out * loss_weight
        return out.astype(out_dtype).reshape(orig_shape)

    # 'mean' / 'sum'
    loss_sum = jnp.zeros((), jnp.float32)
    cnt_sum = jnp.zeros((), jnp.float32)
    if main_rows > 0:
        loss_sum = loss_sum + main_loss_sum
        cnt_sum = cnt_sum + main_cnt_sum
    if tail_n > 0:
        loss_sum = loss_sum + tail_elem.sum()
        cnt_sum = cnt_sum + tail_valid.astype(jnp.float32).sum()

    if reduction == "mean":
        loss = loss_sum / jnp.maximum(cnt_sum, 1.0)
    else:  # "sum"
        loss = loss_sum
    return loss * loss_weight


# ----------------------------- reference & test -------------------------------
def _reference(pred, target, reduction="mean", loss_weight=1.0, eps=-1.0):
    mask = (target > eps).astype(jnp.float32)
    loss = jnp.abs(pred.astype(jnp.float32) - target.astype(jnp.float32)) * mask
    if reduction == "mean":
        loss = loss.sum() / jnp.maximum(mask.sum(), 1.0)
    elif reduction == "sum":
        loss = loss.sum()
    return loss * loss_weight


if __name__ == "__main__":
    key = jax.random.PRNGKey(0)
    loss_weight = 1.0
    eps = -1.0

    # (shape, tile_rows): canonical small NCHW case; unaligned (tail) case;
    # a depth-map sized case; same map with a small tile to exercise the
    # multi-tile + overhang-mask + parallel-grid path; tiny pure-JAX fallback.
    cases = [((2, 4, 16, 16), 4096),
             ((1, 1, 30, 45), 4096),
             ((2, 1, 256, 320), 4096),
             ((2, 1, 256, 320), 512),
             ((2, 3, 7, 5), 4096)]

    ok = True
    for shape, tr in cases:
        key, k1, k2 = jax.random.split(key, 3)
        pred = jax.random.normal(k1, shape, dtype=jnp.float32) * 2.0
        # Target has some values <= eps (-1) so the valid mask is non-trivial.
        target = jax.random.uniform(k2, shape, dtype=jnp.float32,
                                    minval=-3.0, maxval=5.0)
        for reduction in ("mean", "sum", "none"):
            out = metric_depth_l1_loss(pred, target, reduction=reduction,
                                       loss_weight=loss_weight, eps=eps,
                                       tile_rows=tr)
            out = jax.block_until_ready(out)
            ref = _reference(pred, target, reduction=reduction,
                             loss_weight=loss_weight, eps=eps)
            if not jnp.allclose(out, ref, rtol=1e-4, atol=1e-5):
                ok = False

    if ok:
        print("KERNEL_OK")
    else:
        print("KERNEL_MISMATCH")
</pallas_src>

<mosaic_0001>
module attributes {stable_mosaic.version = 11 : i64} {
  func.func @_l1_reduce_kernel(%arg0: i32, %arg1: memref<16x128xf32, #tpu.memory_space<vmem>>, %arg2: memref<16x128xf32, #tpu.memory_space<vmem>>, %arg3: memref<1x8x128xf32, #tpu.memory_space<vmem>>, %arg4: memref<1x8x128xf32, #tpu.memory_space<vmem>>) attributes {dimension_semantics = [#tpu.dimension_semantics<parallel>], iteration_bounds = array<i64: 1>, scalar_prefetch = 0 : i64, scratch_operands = 0 : i64, tpu.core_type = #tpu.core_type<tc>, window_params = [{transform_indices = @transform_0, window_bounds = array<i64: 16, 128>}, {transform_indices = @transform_1, window_bounds = array<i64: 16, 128>}, {transform_indices = @transform_2, window_bounds = array<i64: 1, 8, 128>}, {transform_indices = @transform_3, window_bounds = array<i64: 1, 8, 128>}]} {
    %cst = arith.constant 0.000000e+00 : f32
    %0 = vector.broadcast %cst : f32 to vector<8x128xf32>
    %c0_i32 = arith.constant 0 : i32
    %c16_i32 = arith.constant 16 : i32
    %1 = arith.muli %c0_i32, %c16_i32 : i32
    %2 = tpu.assume_multiple %1, 16 : i32
    %3 = arith.index_cast %2 : i32 to index
    %c0 = arith.constant 0 : index
    %4 = vector.load %arg1[%3, %c0] : memref<16x128xf32, #tpu.memory_space<vmem>>, vector<16x128xf32>
    %5 = arith.index_cast %2 : i32 to index
    %c0_0 = arith.constant 0 : index
    %6 = vector.load %arg2[%5, %c0_0] : memref<16x128xf32, #tpu.memory_space<vmem>>, vector<16x128xf32>
    %cst_1 = arith.constant -1.000000e+00 : f32
    %7 = vector.broadcast %cst_1 : f32 to vector<16x128xf32>
    %8 = arith.cmpf ogt, %6, %7 : vector<16x128xf32>
    %9 = arith.subf %4, %6 : vector<16x128xf32>
    %10 = math.absf %9 : vector<16x128xf32>
    %cst_2 = arith.constant 0.000000e+00 : f32
    %11 = vector.broadcast %cst_2 : f32 to vector<16x128xf32>
    %12 = arith.select %8, %10, %11 : vector<16x128xi1>, vector<16x128xf32>
    %13 = arith.extui %8 : vector<16x128xi1> to vector<16x128xi32>
    %14 = arith.sitofp %13 : vector<16x128xi32> to vector<16x128xf32>
    %15 = vector.shape_cast %12 : vector<16x128xf32> to vector<2x8x128xf32>
    %cst_3 = arith.constant dense<0.000000e+00> : vector<8x128xf32>
    %16 = vector.multi_reduction <add>, %15, %cst_3 [0] : vector<2x8x128xf32> to vector<8x128xf32>
    %17 = arith.addf %0, %16 : vector<8x128xf32>
    %18 = vector.shape_cast %14 : vector<16x128xf32> to vector<2x8x128xf32>
    %cst_4 = arith.constant dense<0.000000e+00> : vector<8x128xf32>
    %19 = vector.multi_reduction <add>, %18, %cst_4 [0] : vector<2x8x128xf32> to vector<8x128xf32>
    %20 = arith.addf %0, %19 : vector<8x128xf32>
    %c1_i32 = arith.constant 1 : i32
    %c0_5 = arith.constant 0 : index
    %c0_6 = arith.constant 0 : index
    %c0_7 = arith.constant 0 : index
    %21 = vector.load %arg3[%c0_5, %c0_6, %c0_7] : memref<1x8x128xf32, #tpu.memory_space<vmem>>, vector<1x8x128xf32>
    %22 = vector.shape_cast %21 : vector<1x8x128xf32> to vector<8x128xf32>
    %23 = vector.shape_cast %17 : vector<8x128xf32> to vector<1x8x128xf32>
    tpu.vector_store %arg3[%c0_5, %c0_6, %c0_7], %23 {strides = array<i32>} : memref<1x8x128xf32, #tpu.memory_space<vmem>>, vector<1x8x128xf32>,
    %c0_8 = arith.constant 0 : index
    %c0_9 = arith.constant 0 : index
    %c0_10 = arith.constant 0 : index
    %24 = vector.load %arg4[%c0_8, %c0_9, %c0_10] : memref<1x8x128xf32, #tpu.memory_space<vmem>>, vector<1x8x128xf32>
    %25 = vector.shape_cast %24 : vector<1x8x128xf32> to vector<8x128xf32>
    %26 = vector.shape_cast %20 : vector<8x128xf32> to vector<1x8x128xf32>
    tpu.vector_store %arg4[%c0_8, %c0_9, %c0_10], %26 {strides = array<i32>} : memref<1x8x128xf32, #tpu.memory_space<vmem>>, vector<1x8x128xf32>,
    return
  }
  func.func @transform_0(%arg0: i32) -> (i32, i32) {
    %c0_i32 = arith.constant 0 : i32
    %c0_i32_0 = arith.constant 0 : i32
    return %arg0, %c0_i32 : i32, i32
  }
  func.func @transform_1(%arg0: i32) -> (i32, i32) {
    %c0_i32 = arith.constant 0 : i32
    %c0_i32_0 = arith.constant 0 : i32
    return %arg0, %c0_i32 : i32, i32
  }
  func.func @transform_2(%arg0: i32) -> (i32, i32, i32) {
    %c0_i32 = arith.constant 0 : i32
    %c0_i32_0 = arith.constant 0 : i32
    %c0_i32_1 = arith.constant 0 : i32
    return %arg0, %c0_i32, %c0_i32_0 : i32, i32, i32
  }
  func.func @transform_3(%arg0: i32) -> (i32, i32, i32) {
    %c0_i32 = arith.constant 0 : i32
    %c0_i32_0 = arith.constant 0 : i32
    %c0_i32_1 = arith.constant 0 : i32
    return %arg0, %c0_i32, %c0_i32_0 : i32, i32, i32
  }
}

</mosaic_0001>

<bundles_post_ra>
// kernel: tpu_custom_call.1
= control target key start
LH: loop header
LB: loop body
LE: loop exit
PB: predicated region body
PF: predicated region fallthrough
CT: control target
= control target key end

     0   :  { %9 = vsyncpa [#allocation3], 0  ;;  %s275_s0 = inlined_call_operand.hbm [shape: f32[16,128], index: 0, kind: input, shape index: {}]   ;;  %s276_s1 = inlined_call_operand.hbm [shape: f32[16,128], index: 1, kind: input, shape index: {}]   ;;  %s277_s2 = inlined_call_operand.hbm [shape: f32[1,8,128], index: 2, kind: output, shape index: {0}]   ;;  %s278_s3 = inlined_call_operand.hbm [shape: f32[1,8,128], index: 3, kind: output, shape index: {1}]  }
   0x1   :  { %10 = vsyncpa [#allocation6], 0 }
   0x2   :  { %11 = vsyncpa [#allocation4], 0 }
   0x3   :  { %12 = vsyncpa [#allocation9], 0  ;;  %s200_s12 = smov [#allocation2]   ;;  %s104_s16 = scalar_lea.hbm %s275_s0, 256 }
   0x4   :  { %s18_s13 = sshll.u32 %s200_s12, 4  ;;  %p105_p0 = scmp.ne.s32.totalorder %s275_s0, %s104_s16  ;;  %s19_s13 = int_to_ptr.vmem [resolvable:$true] %s18_s13 }
   0x5   :  { %p108_p1 = scmp.lt.u32.totalorder %s104_s16, %s275_s0 }
   0x7   :  { %p110_p2 = pnand %p108_p1, %p105_p0 }
   0x9   :  { %113 = shalt.err (!%p110_p2)
}
   0xa   :  { %s114_s21 = scalar_lea.vmem %s19_s13, 256  ;;  %p119_p4 = scmp.lt.s32.totalorder %s19_s13, %s19_s13 }
   0xb   :  { %p115_p3 = scmp.ne.s32.totalorder %s19_s13, %s114_s21  ;;  %p120_p5 = scmp.lt.s32.totalorder %s114_s21, %s114_s21 }
   0xd   :  { %p121_p6 = por %p120_p5, %p119_p4 }
   0xf   :  { %p122_p7 = pnand %p121_p6, %p115_p3 }
  0x11   :  { %125 = shalt.err (!%p122_p7)
}
  0x12   :  { %s201_s22 = smov 128   ;;  %s202_s23 = smov 8  }
  0x13   :  { %24 = dma.hbm_to_vmem [thread:$0]  %s275_s0, 256, %s19_s13, [#allocation3], %s201_s22, %s201_s22, %s202_s23  }
  0x14   :  { %s203_s26 = smov [#allocation5]   ;;  %s126_s30 = scalar_lea.hbm %s276_s1, 256 }
  0x15   :  { %s30_s27 = sshll.u32 %s203_s26, 4  ;;  %p127_p8 = scmp.ne.s32.totalorder %s276_s1, %s126_s30  ;;  %s31_s27 = int_to_ptr.vmem [resolvable:$true] %s30_s27 }
  0x16   :  { %p130_p9 = scmp.lt.u32.totalorder %s126_s30, %s276_s1 }
  0x18   :  { %p132_p10 = pnand %p130_p9, %p127_p8 }
  0x1a   :  { %135 = shalt.err (!%p132_p10)
}
  0x1b   :  { %s136_s8 = scalar_lea.vmem %s31_s27, 256  ;;  %p141_p12 = scmp.lt.s32.totalorder %s31_s27, %s31_s27 }
  0x1c   :  { %p137_p11 = scmp.ne.s32.totalorder %s31_s27, %s136_s8  ;;  %p142_p13 = scmp.lt.s32.totalorder %s136_s8, %s136_s8 }
  0x1e   :  { %p143_p0 = por %p142_p13, %p141_p12 }
  0x20   :  { %p144_p1 = pnand %p143_p0, %p137_p11 }
  0x22   :  { %147 = shalt.err (!%p144_p1)
}
  0x23   :  { %36 = dma.hbm_to_vmem [thread:$0]  %s276_s1, 256, %s31_s27, [#allocation6], %s201_s22, %s201_s22, %s202_s23  }
  0x24   :  { %192 = dma.done.wait [#allocation3], 256  }
  0x25   :  { %193 = vsyncadd [#allocation3], 4294967040 }
  0x26   :  { %194 = dma.done.wait [#allocation6], 256  }
  0x27   :  { %195 = vsyncadd [#allocation6], 4294967040  ;;  %v43_v0 = vld [vmem:[#allocation2] sm:$0xff]  ;;  %v44_v1 = vld [vmem:[#allocation2 + $0x8] sm:$0xff]  ;;  %s204_s10 = smov [#allocation8]   ;;  %v205_v6 = vmov 0.0  }
  0x28   :  { %v45_v2 = vld [vmem:[#allocation5] sm:$0xff]  ;;  %v46_v3 = vld [vmem:[#allocation5 + $0x8] sm:$0xff]  ;;  %s81_s11 = sshll.u32 %s204_s10, 4  ;;  %s206_s12 = smov [#allocation7]   ;;  %s82_s11 = int_to_ptr.vmem [resolvable:$true] %s81_s11 }
  0x29   :  { %vm47_vm0 = vcmp.gt.f32.partialorder %v45_v2, -1.0  ;;  %v49_v4 = vsub.f32 %v43_v0, %v45_v2  ;;  %vm48_vm1 = vcmp.gt.f32.partialorder %v46_v3, -1.0  ;;  %v50_v5 = vsub.f32 %v44_v1, %v46_v3  ;;  %s71_s1 = sshll.u32 %s206_s12, 4  ;;  %s148_s13 = scalar_lea.vmem %s82_s11, 128  ;;  %s72_s1 = int_to_ptr.vmem [resolvable:$true] %s71_s1 }
  0x2a   :  { %v95_v7 = vsel %vm47_vm0, 1.0, %v205_v6  ;;  %v96_v9 = vsel %vm48_vm1, 1.0, %v205_v6  ;;  %p149_p2 = scmp.ne.s32.totalorder %s82_s11, %s148_s13  ;;  %p153_p3 = scmp.lt.s32.totalorder %s82_s11, %s82_s11 }
  0x2b   :  { %v51_v8 = vand.u32 2147483647, %v49_v4  ;;  %v52_v10 = vand.u32 2147483647, %v50_v5  ;;  %v61_v11 = vadd.f32 %v96_v9, %v95_v7  ;;  %p154_p4 = scmp.lt.s32.totalorder %s148_s13, %s148_s13 }
  0x2d   :  { %v53_v12 = vsel %vm47_vm0, %v51_v8, 0.0  ;;  %v54_v13 = vsel %vm48_vm1, %v52_v10, 0.0  ;;  %64 = vst [vmem:[#allocation8] sm:$0xff] %v61_v11  ;;  %p155_p5 = por %p154_p4, %p153_p3 }
  0x2e   :  { %v59_v14 = vadd.f32 %v54_v13, %v53_v12 }
  0x2f   :  { %p156_p6 = pnand %p155_p5, %p149_p2 }
  0x31   :  { %159 = shalt.err (!%p156_p6)
}
  0x32   :  { %s160_s16 = scalar_lea.hbm %s278_s3, 128 }
  0x33   :  { %p161_p7 = scmp.ne.s32.totalorder %s278_s3, %s160_s16  ;;  %p164_p8 = scmp.lt.u32.totalorder %s160_s16, %s278_s3 }
  0x35   :  { %p166_p9 = pnand %p164_p8, %p161_p7 }
  0x37   :  { %169 = shalt.err (!%p166_p9)
}
  0x38   :  { %84 = dma.vmem_to_hbm [thread:$0]  %s82_s11, 128, %s278_s3, [#allocation9]   ;;  %63 = vst [vmem:[#allocation7] sm:$0xff] %v59_v14 }
  0x39   :  { %s170_s23 = scalar_lea.vmem %s72_s1, 128  ;;  %p175_p11 = scmp.lt.s32.totalorder %s72_s1, %s72_s1 }
  0x3a   :  { %p171_p10 = scmp.ne.s32.totalorder %s72_s1, %s170_s23  ;;  %p176_p12 = scmp.lt.s32.totalorder %s170_s23, %s170_s23 }
  0x3c   :  { %p177_p13 = por %p176_p12, %p175_p11 }
  0x3e   :  { %p178_p0 = pnand %p177_p13, %p171_p10 }
  0x40   :  { %181 = shalt.err (!%p178_p0)
}
  0x41   :  { %s182_s26 = scalar_lea.hbm %s277_s2, 128 }
  0x42   :  { %p183_p1 = scmp.ne.s32.totalorder %s277_s2, %s182_s26  ;;  %p186_p2 = scmp.lt.u32.totalorder %s182_s26, %s277_s2 }
  0x44   :  { %p188_p3 = pnand %p186_p2, %p183_p1 }
  0x46   :  { %191 = shalt.err (!%p188_p3)
}
  0x47   :  { %74 = dma.vmem_to_hbm [thread:$0]  %s72_s1, 128, %s277_s2, [#allocation4]  }
  0x48   :  { %196 = dma.done.wait [#allocation4], 128  }
  0x49   :  { %197 = vsyncadd [#allocation4], 4294967168 }
  0x4a   :  { %198 = dma.done.wait [#allocation9], 128  }
  0x4b   :  { %199 = vsyncadd [#allocation9], 4294967168 }
  0x4c   :  { %91 = vsyncpa [#allocation3], 1 }
  0x4d   :  { %92 = vsyncpa [#allocation6], 1 }
  0x4e   :  { %93 = vsyncpa [#allocation4], 1 }
  0x4f   :  { %94 = vsyncpa [#allocation9], 1 }

</bundles_post_ra>
